<compile_context>
chip_gen: v6e
topology: v6e:2x2x1
jax: 0.10.0
libtpu: 0.0.40
codegen_flags: <defaults>
</compile_context>

<pallas_src>
import functools

import jax
import jax.numpy as jnp
import numpy as np
from jax.experimental import pallas as pl
from jax.experimental.pallas import tpu as pltpu


# ----------------------------------- kernel -----------------------------------
def cbam_kernel(x_ref, w1_ref, b1_ref, w2_ref, b2_ref, cw_ref, cb_ref, o_ref,
                *, H, W, k):
    """Fused CBAM forward for a (Bt, C, HW) block of images.

    x_ref  : (Bt, C, HW) f32, HW lane-dense
    w1_ref : (mid, C)    Linear1 weight
    b1_ref : (mid, 1)    Linear1 bias
    w2_ref : (C, mid)    Linear2 weight
    b2_ref : (C, 1)      Linear2 bias
    cw_ref : (2*k*k,)    SMEM conv taps: [avg-channel taps..., max-channel taps...]
    cb_ref : (1,)        SMEM conv bias
    o_ref  : (Bt, C, HW)
    """
    Bt = x_ref.shape[0]
    HW = H * W
    pad = k // 2

    w1 = w1_ref[...]
    b1 = b1_ref[...]
    w2 = w2_ref[...]
    b2 = b2_ref[...]
    conv_bias = cb_ref[0]

    # Hoisted, loop-invariant helpers for the k x k conv taps (flattened layout).
    pos = jax.lax.broadcasted_iota(jnp.int32, (1, HW), 1)   # flattened spatial idx
    col = pos % W                                           # column (w) index
    taps = []                                               # (tap_idx, flat_shift, mask or None)
    for dh in range(-pad, pad + 1):
        for dw in range(-pad, pad + 1):
            idx = (dh + pad) * k + (dw + pad)
            s = dh * W + dw
            conds = []
            if dh < 0:
                conds.append(pos >= (-dh) * W)
            elif dh > 0:
                conds.append(pos < (H - dh) * W)
            if dw < 0:
                conds.append(col >= -dw)
            elif dw > 0:
                conds.append(col < W - dw)
            mask = None
            if conds:
                mask = conds[0]
                for c in conds[1:]:
                    mask = mask & c
            taps.append((idx, s, mask))

    def one_image(i):
        x = x_ref[i]                                        # (C, HW)

        # ----- channel attention -----
        avg = jnp.mean(x, axis=-1, keepdims=True)           # (C, 1)  AdaptiveAvgPool2d(1)
        mx = jnp.max(x, axis=-1, keepdims=True)             # (C, 1)  AdaptiveMaxPool2d(1)
        pooled = jnp.concatenate([avg, mx], axis=-1)        # (C, 2)  -> one matmul per layer

        h = jnp.dot(w1, pooled, preferred_element_type=jnp.float32) + b1     # (mid, 2)
        h = jnp.maximum(h, 0.0)
        mo = jnp.dot(w2, h, preferred_element_type=jnp.float32) + b2         # (C, 2)
        ca = jax.nn.sigmoid(mo[:, 0:1] + mo[:, 1:2])        # (C, 1)

        out1 = x * ca                                        # (C, HW) channel-gated

        # ----- spatial attention (lane-dense) -----
        sp_avg = jnp.mean(out1, axis=0, keepdims=True)       # (1, HW)
        sp_max = jnp.max(out1, axis=0, keepdims=True)        # (1, HW)

        acc = jnp.full((1, HW), conv_bias, jnp.float32)
        for idx, s, mask in taps:
            if s == 0:
                ra, rm = sp_avg, sp_max
            else:
                shift = (-s) % HW                            # rolled[p] = map[p + s]
                ra = pltpu.roll(sp_avg, shift=shift, axis=1)
                rm = pltpu.roll(sp_max, shift=shift, axis=1)
            contrib = cw_ref[idx] * ra + cw_ref[k * k + idx] * rm
            if mask is not None:                             # zero "SAME" padding
                contrib = jnp.where(mask, contrib, 0.0)
            acc = acc + contrib

        sa = jax.nn.sigmoid(acc)                             # (1, HW)
        o_ref[i] = out1 * sa                                 # broadcast over C

    if Bt <= 8:
        for i in range(Bt):                                  # static unroll, small blocks
            one_image(i)
    else:
        @pl.loop(0, Bt)
        def _(i):
            one_image(i)


# ----------------------------------- wrapper -----------------------------------
def _choose_block_batch(B, C, HW, *, target_block_bytes=4 << 20):
    """Pick images-per-block: big enough to amortize per-step overhead, small
    enough for VMEM, and >= 2 grid steps so dual-TC chips can split the batch."""
    per_image = C * HW * 4
    bt = int(max(1, min(B, target_block_bytes // max(per_image, 1))))
    if B >= 2:
        bt = min(bt, (B + 1) // 2)
    while B % bt:
        bt -= 1
    return bt


def cbam_forward(x, params, *, k_size=3):
    w1, b1, w2, b2, cw, cb = params   # PyTorch shapes: (mid,C),(mid,),(C,mid),(C,),(1,2,k,k),(1,)
    B, C, H, W = x.shape
    HW = H * W
    mid = w1.shape[0]

    x_flat = x.reshape(B, C, HW)
    b1c = b1.reshape(mid, 1)
    b2c = b2.reshape(C, 1)
    cw_flat = cw.reshape(2 * k_size * k_size).astype(jnp.float32)   # avg taps, then max taps
    cb_flat = cb.reshape(1).astype(jnp.float32)

    bt = _choose_block_batch(B, C, HW)
    block_bytes = bt * C * HW * 4
    vmem_limit = int(min(48 << 20, max(32 << 20, 8 * block_bytes)))

    out_flat = pl.pallas_call(
        functools.partial(cbam_kernel, H=H, W=W, k=k_size),
        out_shape=jax.ShapeDtypeStruct((B, C, HW), jnp.float32),
        grid=(B // bt,),
        in_specs=[
            pl.BlockSpec((bt, C, HW), lambda b: (b, 0, 0)),
            pl.BlockSpec((mid, C), lambda b: (0, 0)),
            pl.BlockSpec((mid, 1), lambda b: (0, 0)),
            pl.BlockSpec((C, mid), lambda b: (0, 0)),
            pl.BlockSpec((C, 1), lambda b: (0, 0)),
            pl.BlockSpec(memory_space=pltpu.MemorySpace.SMEM),   # conv taps (2*k*k,)
            pl.BlockSpec(memory_space=pltpu.MemorySpace.SMEM),   # conv bias (1,)
        ],
        out_specs=pl.BlockSpec((bt, C, HW), lambda b: (b, 0, 0)),
        compiler_params=pltpu.CompilerParams(
            dimension_semantics=("parallel",),
            vmem_limit_bytes=vmem_limit,
        ),
    )(x_flat, w1, b1c, w2, b2c, cw_flat, cb_flat)

    return out_flat.reshape(B, C, H, W)


# ----------------------------- pure-JAX reference -----------------------------
def cbam_reference(x, params, *, k_size=3):
    w1, b1, w2, b2, cw, cb = params

    avg = x.mean(axis=(2, 3))   # (B, C)
    mx = x.max(axis=(2, 3))     # (B, C)

    def mlp(v):
        h = jnp.maximum(
            jnp.dot(v, w1.T, precision=jax.lax.Precision.HIGHEST) + b1, 0.0)
        return jnp.dot(h, w2.T, precision=jax.lax.Precision.HIGHEST) + b2

    ca = jax.nn.sigmoid(mlp(avg) + mlp(mx))[:, :, None, None]
    out1 = x * ca

    sp = jnp.concatenate(
        [out1.mean(axis=1, keepdims=True), out1.max(axis=1, keepdims=True)], axis=1)
    conv = jax.lax.conv_general_dilated(
        sp, cw, window_strides=(1, 1), padding="SAME",
        dimension_numbers=("NCHW", "OIHW", "NCHW"),
        precision=jax.lax.Precision.HIGHEST) + cb[0]
    return out1 * jax.nn.sigmoid(conv)


if __name__ == "__main__":
    B, C, H, W = 2, 32, 16, 16
    reduction, k_size = 16, 3
    mid = C // reduction  # 2

    key = jax.random.PRNGKey(0)
    k_x, k_w1, k_b1, k_w2, k_b2, k_cw, k_cb = jax.random.split(key, 7)

    x = jax.random.normal(k_x, (B, C, H, W), dtype=jnp.float32)

    # PyTorch-shaped parameters: Linear(C, mid), Linear(mid, C), Conv2d(2, 1, k, padding=k//2).
    w1 = jax.random.normal(k_w1, (mid, C), dtype=jnp.float32) * 0.2          # Linear1 weight
    b1 = jax.random.normal(k_b1, (mid,), dtype=jnp.float32) * 0.1            # Linear1 bias
    w2 = jax.random.normal(k_w2, (C, mid), dtype=jnp.float32) * 0.2          # Linear2 weight
    b2 = jax.random.normal(k_b2, (C,), dtype=jnp.float32) * 0.1              # Linear2 bias
    cw = jax.random.normal(k_cw, (1, 2, k_size, k_size), dtype=jnp.float32) * 0.3  # conv weight OIHW
    cb = jax.random.normal(k_cb, (1,), dtype=jnp.float32) * 0.1              # conv bias

    params = (w1, b1, w2, b2, cw, cb)

    out = jax.block_until_ready(cbam_forward(x, params, k_size=k_size))
    ref = jax.block_until_ready(cbam_reference(x, params, k_size=k_size))
    np.testing.assert_allclose(np.asarray(out), np.asarray(ref), rtol=1e-4, atol=1e-4)

    print("KERNEL_OK")
</pallas_src>

<mosaic_0001>
module attributes {stable_mosaic.version = 11 : i64} {
  func.func @cbam_kernel(%arg0: i32, %arg1: memref<1x32x256xf32, #tpu.memory_space<vmem>>, %arg2: memref<2x32xf32, #tpu.memory_space<vmem>>, %arg3: memref<2x1xf32, #tpu.memory_space<vmem>>, %arg4: memref<32x2xf32, #tpu.memory_space<vmem>>, %arg5: memref<32x1xf32, #tpu.memory_space<vmem>>, %arg6: memref<18xf32, #tpu.memory_space<smem>>, %arg7: memref<1xf32, #tpu.memory_space<smem>>, %arg8: memref<1x32x256xf32, #tpu.memory_space<vmem>>) attributes {dimension_semantics = [#tpu.dimension_semantics<parallel>], iteration_bounds = array<i64: 2>, scalar_prefetch = 0 : i64, scratch_operands = 0 : i64, tpu.core_type = #tpu.core_type<tc>, window_params = [{transform_indices = @transform_0, window_bounds = array<i64: 1, 32, 256>}, {pipeline_mode = #tpu.pipeline_mode<synchronous>, transform_indices = @transform_1, window_bounds = array<i64: 2, 32>}, {pipeline_mode = #tpu.pipeline_mode<synchronous>, transform_indices = @transform_2, window_bounds = array<i64: 2, 1>}, {pipeline_mode = #tpu.pipeline_mode<synchronous>, transform_indices = @transform_3, window_bounds = array<i64: 32, 2>}, {pipeline_mode = #tpu.pipeline_mode<synchronous>, transform_indices = @transform_4, window_bounds = array<i64: 32, 1>}, {transform_indices = @transform_5, window_bounds = array<i64: 18>}, {transform_indices = @transform_6, window_bounds = array<i64: 1>}, {transform_indices = @transform_7, window_bounds = array<i64: 1, 32, 256>}]} {
    %c0 = arith.constant 0 : index
    %c0_0 = arith.constant 0 : index
    %0 = vector.load %arg2[%c0, %c0_0] : memref<2x32xf32, #tpu.memory_space<vmem>>, vector<2x32xf32>
    %c0_1 = arith.constant 0 : index
    %c0_2 = arith.constant 0 : index
    %1 = vector.load %arg3[%c0_1, %c0_2] : memref<2x1xf32, #tpu.memory_space<vmem>>, vector<2x1xf32>
    %c0_3 = arith.constant 0 : index
    %c0_4 = arith.constant 0 : index
    %2 = vector.load %arg4[%c0_3, %c0_4] : memref<32x2xf32, #tpu.memory_space<vmem>>, vector<32x2xf32>
    %c0_5 = arith.constant 0 : index
    %c0_6 = arith.constant 0 : index
    %3 = vector.load %arg5[%c0_5, %c0_6] : memref<32x1xf32, #tpu.memory_space<vmem>>, vector<32x1xf32>
    %c0_7 = arith.constant 0 : index
    %4 = memref.load %arg7[%c0_7] : memref<1xf32, #tpu.memory_space<smem>>
    %5 = tpu.iota {dimensions = array<i32: 1>} : vector<1x256xi32>
    %c16_i32 = arith.constant 16 : i32
    %c0_i32 = arith.constant 0 : i32
    %6 = arith.cmpi eq, %c16_i32, %c0_i32 : i32
    %c1_i32 = arith.constant 1 : i32
    %7 = arith.select %6, %c1_i32, %c16_i32 : i32
    %8 = vector.broadcast %7 : i32 to vector<1x256xi32>
    %9 = arith.remsi %5, %8 : vector<1x256xi32>
    %c0_i32_8 = arith.constant 0 : i32
    %10 = vector.broadcast %c0_i32_8 : i32 to vector<1x256xi32>
    %11 = arith.cmpi ne, %9, %10 : vector<1x256xi32>
    %c0_i32_9 = arith.constant 0 : i32
    %12 = vector.broadcast %c0_i32_9 : i32 to vector<1x256xi32>
    %13 = arith.cmpi slt, %9, %12 : vector<1x256xi32>
    %c0_i32_10 = arith.constant 0 : i32
    %14 = arith.cmpi slt, %7, %c0_i32_10 : i32
    %15 = vector.broadcast %14 : i1 to vector<1x256xi1>
    %16 = vector.broadcast %15 : vector<1x256xi1> to vector<1x256xi1>
    %17 = arith.xori %13, %16 : vector<1x256xi1>
    %18 = arith.andi %17, %11 : vector<1x256xi1>
    %19 = vector.broadcast %7 : i32 to vector<1x256xi32>
    %20 = arith.addi %9, %19 : vector<1x256xi32>
    %21 = arith.select %18, %20, %9 : vector<1x256xi1>, vector<1x256xi32>
    %c16_i32_11 = arith.constant 16 : i32
    %22 = vector.broadcast %c16_i32_11 : i32 to vector<1x256xi32>
    %23 = arith.cmpi sge, %5, %22 : vector<1x256xi32>
    %c1_i32_12 = arith.constant 1 : i32
    %24 = vector.broadcast %c1_i32_12 : i32 to vector<1x256xi32>
    %25 = arith.cmpi sge, %21, %24 : vector<1x256xi32>
    %26 = arith.andi %23, %25 : vector<1x256xi1>
    %c16_i32_13 = arith.constant 16 : i32
    %27 = vector.broadcast %c16_i32_13 : i32 to vector<1x256xi32>
    %28 = arith.cmpi sge, %5, %27 : vector<1x256xi32>
    %c16_i32_14 = arith.constant 16 : i32
    %29 = vector.broadcast %c16_i32_14 : i32 to vector<1x256xi32>
    %30 = arith.cmpi sge, %5, %29 : vector<1x256xi32>
    %c15_i32 = arith.constant 15 : i32
    %31 = vector.broadcast %c15_i32 : i32 to vector<1x256xi32>
    %32 = arith.cmpi slt, %21, %31 : vector<1x256xi32>
    %33 = arith.andi %30, %32 : vector<1x256xi1>
    %c1_i32_15 = arith.constant 1 : i32
    %34 = vector.broadcast %c1_i32_15 : i32 to vector<1x256xi32>
    %35 = arith.cmpi sge, %21, %34 : vector<1x256xi32>
    %c15_i32_16 = arith.constant 15 : i32
    %36 = vector.broadcast %c15_i32_16 : i32 to vector<1x256xi32>
    %37 = arith.cmpi slt, %21, %36 : vector<1x256xi32>
    %c240_i32 = arith.constant 240 : i32
    %38 = vector.broadcast %c240_i32 : i32 to vector<1x256xi32>
    %39 = arith.cmpi slt, %5, %38 : vector<1x256xi32>
    %c1_i32_17 = arith.constant 1 : i32
    %40 = vector.broadcast %c1_i32_17 : i32 to vector<1x256xi32>
    %41 = arith.cmpi sge, %21, %40 : vector<1x256xi32>
    %42 = arith.andi %39, %41 : vector<1x256xi1>
    %c240_i32_18 = arith.constant 240 : i32
    %43 = vector.broadcast %c240_i32_18 : i32 to vector<1x256xi32>
    %44 = arith.cmpi slt, %5, %43 : vector<1x256xi32>
    %c240_i32_19 = arith.constant 240 : i32
    %45 = vector.broadcast %c240_i32_19 : i32 to vector<1x256xi32>
    %46 = arith.cmpi slt, %5, %45 : vector<1x256xi32>
    %c15_i32_20 = arith.constant 15 : i32
    %47 = vector.broadcast %c15_i32_20 : i32 to vector<1x256xi32>
    %48 = arith.cmpi slt, %21, %47 : vector<1x256xi32>
    %49 = arith.andi %46, %48 : vector<1x256xi1>
    %c0_21 = arith.constant 0 : index
    %c0_22 = arith.constant 0 : index
    %c0_23 = arith.constant 0 : index
    %50 = vector.load %arg1[%c0_21, %c0_22, %c0_23] : memref<1x32x256xf32, #tpu.memory_space<vmem>>, vector<1x32x256xf32>
    %51 = vector.shape_cast %50 : vector<1x32x256xf32> to vector<32x256xf32>
    %cst = arith.constant dense<0.000000e+00> : vector<32xf32>
    %52 = vector.multi_reduction <add>, %51, %cst [1] : vector<32x256xf32> to vector<32xf32>
    %53 = vector.shape_cast %52 : vector<32xf32> to vector<32x1xf32>
    %cst_24 = arith.constant 2.560000e+02 : f32
    %54 = vector.broadcast %cst_24 : f32 to vector<32x1xf32>
    %55 = arith.divf %53, %54 : vector<32x1xf32>
    %cst_25 = arith.constant dense<0xFF800000> : vector<32xf32>
    %56 = vector.multi_reduction <maximumf>, %51, %cst_25 [1] : vector<32x256xf32> to vector<32xf32>
    %57 = vector.shape_cast %56 : vector<32xf32> to vector<32x1xf32>
    %58 = tpu.concatenate %55, %57 in 1 : vector<32x1xf32>, vector<32x1xf32> -> vector<32x2xf32>
    %cst_26 = arith.constant dense<0.000000e+00> : vector<2x2xf32>
    %59 = tpu.matmul %0, %58, %cst_26 {dimension_numbers = #tpu.dot_dimension_numbers<[1], [0], [0], [1], [0, 0, 1, 1], [], []>} : vector<2x32xf32>, vector<32x2xf32>, vector<2x2xf32> -> vector<2x2xf32>
    %60 = vector.broadcast %1 : vector<2x1xf32> to vector<2x2xf32>
    %61 = arith.addf %59, %60 : vector<2x2xf32>
    %cst_27 = arith.constant 0.000000e+00 : f32
    %62 = vector.broadcast %cst_27 : f32 to vector<2x2xf32>
    %63 = arith.maximumf %61, %62 : vector<2x2xf32>
    %cst_28 = arith.constant dense<0.000000e+00> : vector<32x2xf32>
    %64 = tpu.matmul %2, %63, %cst_28 {dimension_numbers = #tpu.dot_dimension_numbers<[1], [0], [0], [1], [0, 0, 1, 1], [], []>} : vector<32x2xf32>, vector<2x2xf32>, vector<32x2xf32> -> vector<32x2xf32>
    %65 = vector.broadcast %3 : vector<32x1xf32> to vector<32x2xf32>
    %66 = arith.addf %64, %65 : vector<32x2xf32>
    %67 = vector.extract_strided_slice %66 {offsets = [0, 0], sizes = [32, 1], strides = [1, 1]} : vector<32x2xf32> to vector<32x1xf32>
    %68 = vector.extract_strided_slice %66 {offsets = [0, 1], sizes = [32, 1], strides = [1, 1]} : vector<32x2xf32> to vector<32x1xf32>
    %69 = arith.addf %67, %68 : vector<32x1xf32>
    %70 = arith.negf %69 : vector<32x1xf32>
    %71 = math.exp %70 : vector<32x1xf32>
    %cst_29 = arith.constant 1.000000e+00 : f32
    %72 = vector.broadcast %cst_29 : f32 to vector<32x1xf32>
    %73 = arith.addf %72, %71 : vector<32x1xf32>
    %74 = arith.divf %72, %73 : vector<32x1xf32>
    %75 = vector.broadcast %74 : vector<32x1xf32> to vector<32x256xf32>
    %76 = arith.mulf %51, %75 : vector<32x256xf32>
    %cst_30 = arith.constant dense<0.000000e+00> : vector<256xf32>
    %77 = vector.multi_reduction <add>, %76, %cst_30 [0] : vector<32x256xf32> to vector<256xf32>
    %78 = vector.shape_cast %77 : vector<256xf32> to vector<1x256xf32>
    %cst_31 = arith.constant 3.200000e+01 : f32
    %79 = vector.broadcast %cst_31 : f32 to vector<1x256xf32>
    %80 = arith.divf %78, %79 : vector<1x256xf32>
    %cst_32 = arith.constant dense<0xFF800000> : vector<256xf32>
    %81 = vector.multi_reduction <maximumf>, %76, %cst_32 [0] : vector<32x256xf32> to vector<256xf32>
    %82 = vector.shape_cast %81 : vector<256xf32> to vector<1x256xf32>
    %83 = vector.broadcast %4 : f32 to vector<1x256xf32>
    %c17_i32 = arith.constant 17 : i32
    %84 = tpu.dynamic_rotate %80 by %c17_i32 dim 1 : vector<1x256xf32>, i32 -> vector<1x256xf32>
    %c17_i32_33 = arith.constant 17 : i32
    %85 = tpu.dynamic_rotate %82 by %c17_i32_33 dim 1 : vector<1x256xf32>, i32 -> vector<1x256xf32>
    %c0_34 = arith.constant 0 : index
    %86 = memref.load %arg6[%c0_34] : memref<18xf32, #tpu.memory_space<smem>>
    %87 = vector.broadcast %86 : f32 to vector<1x256xf32>
    %88 = arith.mulf %87, %84 : vector<1x256xf32>
    %c9 = arith.constant 9 : index
    %89 = memref.load %arg6[%c9] : memref<18xf32, #tpu.memory_space<smem>>
    %90 = vector.broadcast %89 : f32 to vector<1x256xf32>
    %91 = arith.mulf %90, %85 : vector<1x256xf32>
    %92 = arith.addf %88, %91 : vector<1x256xf32>
    %cst_35 = arith.constant 0.000000e+00 : f32
    %93 = vector.broadcast %cst_35 : f32 to vector<1x256xf32>
    %94 = arith.select %26, %92, %93 : vector<1x256xi1>, vector<1x256xf32>
    %95 = arith.addf %83, %94 : vector<1x256xf32>
    %c16_i32_36 = arith.constant 16 : i32
    %96 = tpu.dynamic_rotate %80 by %c16_i32_36 dim 1 : vector<1x256xf32>, i32 -> vector<1x256xf32>
    %c16_i32_37 = arith.constant 16 : i32
    %97 = tpu.dynamic_rotate %82 by %c16_i32_37 dim 1 : vector<1x256xf32>, i32 -> vector<1x256xf32>
    %c1 = arith.constant 1 : index
    %98 = memref.load %arg6[%c1] : memref<18xf32, #tpu.memory_space<smem>>
    %99 = vector.broadcast %98 : f32 to vector<1x256xf32>
    %100 = arith.mulf %99, %96 : vector<1x256xf32>
    %c10 = arith.constant 10 : index
    %101 = memref.load %arg6[%c10] : memref<18xf32, #tpu.memory_space<smem>>
    %102 = vector.broadcast %101 : f32 to vector<1x256xf32>
    %103 = arith.mulf %102, %97 : vector<1x256xf32>
    %104 = arith.addf %100, %103 : vector<1x256xf32>
    %cst_38 = arith.constant 0.000000e+00 : f32
    %105 = vector.broadcast %cst_38 : f32 to vector<1x256xf32>
    %106 = arith.select %28, %104, %105 : vector<1x256xi1>, vector<1x256xf32>
    %107 = arith.addf %95, %106 : vector<1x256xf32>
    %c15_i32_39 = arith.constant 15 : i32
    %108 = tpu.dynamic_rotate %80 by %c15_i32_39 dim 1 : vector<1x256xf32>, i32 -> vector<1x256xf32>
    %c15_i32_40 = arith.constant 15 : i32
    %109 = tpu.dynamic_rotate %82 by %c15_i32_40 dim 1 : vector<1x256xf32>, i32 -> vector<1x256xf32>
    %c2 = arith.constant 2 : index
    %110 = memref.load %arg6[%c2] : memref<18xf32, #tpu.memory_space<smem>>
    %111 = vector.broadcast %110 : f32 to vector<1x256xf32>
    %112 = arith.mulf %111, %108 : vector<1x256xf32>
    %c11 = arith.constant 11 : index
    %113 = memref.load %arg6[%c11] : memref<18xf32, #tpu.memory_space<smem>>
    %114 = vector.broadcast %113 : f32 to vector<1x256xf32>
    %115 = arith.mulf %114, %109 : vector<1x256xf32>
    %116 = arith.addf %112, %115 : vector<1x256xf32>
    %cst_41 = arith.constant 0.000000e+00 : f32
    %117 = vector.broadcast %cst_41 : f32 to vector<1x256xf32>
    %118 = arith.select %33, %116, %117 : vector<1x256xi1>, vector<1x256xf32>
    %119 = arith.addf %107, %118 : vector<1x256xf32>
    %c1_i32_42 = arith.constant 1 : i32
    %120 = tpu.dynamic_rotate %80 by %c1_i32_42 dim 1 : vector<1x256xf32>, i32 -> vector<1x256xf32>
    %c1_i32_43 = arith.constant 1 : i32
    %121 = tpu.dynamic_rotate %82 by %c1_i32_43 dim 1 : vector<1x256xf32>, i32 -> vector<1x256xf32>
    %c3 = arith.constant 3 : index
    %122 = memref.load %arg6[%c3] : memref<18xf32, #tpu.memory_space<smem>>
    %123 = vector.broadcast %122 : f32 to vector<1x256xf32>
    %124 = arith.mulf %123, %120 : vector<1x256xf32>
    %c12 = arith.constant 12 : index
    %125 = memref.load %arg6[%c12] : memref<18xf32, #tpu.memory_space<smem>>
    %126 = vector.broadcast %125 : f32 to vector<1x256xf32>
    %127 = arith.mulf %126, %121 : vector<1x256xf32>
    %128 = arith.addf %124, %127 : vector<1x256xf32>
    %cst_44 = arith.constant 0.000000e+00 : f32
    %129 = vector.broadcast %cst_44 : f32 to vector<1x256xf32>
    %130 = arith.select %35, %128, %129 : vector<1x256xi1>, vector<1x256xf32>
    %131 = arith.addf %119, %130 : vector<1x256xf32>
    %c4 = arith.constant 4 : index
    %132 = memref.load %arg6[%c4] : memref<18xf32, #tpu.memory_space<smem>>
    %133 = vector.broadcast %132 : f32 to vector<1x256xf32>
    %134 = arith.mulf %133, %80 : vector<1x256xf32>
    %c13 = arith.constant 13 : index
    %135 = memref.load %arg6[%c13] : memref<18xf32, #tpu.memory_space<smem>>
    %136 = vector.broadcast %135 : f32 to vector<1x256xf32>
    %137 = arith.mulf %136, %82 : vector<1x256xf32>
    %138 = arith.addf %134, %137 : vector<1x256xf32>
    %139 = arith.addf %131, %138 : vector<1x256xf32>
    %c255_i32 = arith.constant 255 : i32
    %140 = tpu.dynamic_rotate %80 by %c255_i32 dim 1 : vector<1x256xf32>, i32 -> vector<1x256xf32>
    %c255_i32_45 = arith.constant 255 : i32
    %141 = tpu.dynamic_rotate %82 by %c255_i32_45 dim 1 : vector<1x256xf32>, i32 -> vector<1x256xf32>
    %c5 = arith.constant 5 : index
    %142 = memref.load %arg6[%c5] : memref<18xf32, #tpu.memory_space<smem>>
    %143 = vector.broadcast %142 : f32 to vector<1x256xf32>
    %144 = arith.mulf %143, %140 : vector<1x256xf32>
    %c14 = arith.constant 14 : index
    %145 = memref.load %arg6[%c14] : memref<18xf32, #tpu.memory_space<smem>>
    %146 = vector.broadcast %145 : f32 to vector<1x256xf32>
    %147 = arith.mulf %146, %141 : vector<1x256xf32>
    %148 = arith.addf %144, %147 : vector<1x256xf32>
    %cst_46 = arith.constant 0.000000e+00 : f32
    %149 = vector.broadcast %cst_46 : f32 to vector<1x256xf32>
    %150 = arith.select %37, %148, %149 : vector<1x256xi1>, vector<1x256xf32>
    %151 = arith.addf %139, %150 : vector<1x256xf32>
    %c241_i32 = arith.constant 241 : i32
    %152 = tpu.dynamic_rotate %80 by %c241_i32 dim 1 : vector<1x256xf32>, i32 -> vector<1x256xf32>
    %c241_i32_47 = arith.constant 241 : i32
    %153 = tpu.dynamic_rotate %82 by %c241_i32_47 dim 1 : vector<1x256xf32>, i32 -> vector<1x256xf32>
    %c6 = arith.constant 6 : index
    %154 = memref.load %arg6[%c6] : memref<18xf32, #tpu.memory_space<smem>>
    %155 = vector.broadcast %154 : f32 to vector<1x256xf32>
    %156 = arith.mulf %155, %152 : vector<1x256xf32>
    %c15 = arith.constant 15 : index
    %157 = memref.load %arg6[%c15] : memref<18xf32, #tpu.memory_space<smem>>
    %158 = vector.broadcast %157 : f32 to vector<1x256xf32>
    %159 = arith.mulf %158, %153 : vector<1x256xf32>
    %160 = arith.addf %156, %159 : vector<1x256xf32>
    %cst_48 = arith.constant 0.000000e+00 : f32
    %161 = vector.broadcast %cst_48 : f32 to vector<1x256xf32>
    %162 = arith.select %42, %160, %161 : vector<1x256xi1>, vector<1x256xf32>
    %163 = arith.addf %151, %162 : vector<1x256xf32>
    %c240_i32_49 = arith.constant 240 : i32
    %164 = tpu.dynamic_rotate %80 by %c240_i32_49 dim 1 : vector<1x256xf32>, i32 -> vector<1x256xf32>
    %c240_i32_50 = arith.constant 240 : i32
    %165 = tpu.dynamic_rotate %82 by %c240_i32_50 dim 1 : vector<1x256xf32>, i32 -> vector<1x256xf32>
    %c7 = arith.constant 7 : index
    %166 = memref.load %arg6[%c7] : memref<18xf32, #tpu.memory_space<smem>>
    %167 = vector.broadcast %166 : f32 to vector<1x256xf32>
    %168 = arith.mulf %167, %164 : vector<1x256xf32>
    %c16 = arith.constant 16 : index
    %169 = memref.load %arg6[%c16] : memref<18xf32, #tpu.memory_space<smem>>
    %170 = vector.broadcast %169 : f32 to vector<1x256xf32>
    %171 = arith.mulf %170, %165 : vector<1x256xf32>
    %172 = arith.addf %168, %171 : vector<1x256xf32>
    %cst_51 = arith.constant 0.000000e+00 : f32
    %173 = vector.broadcast %cst_51 : f32 to vector<1x256xf32>
    %174 = arith.select %44, %172, %173 : vector<1x256xi1>, vector<1x256xf32>
    %175 = arith.addf %163, %174 : vector<1x256xf32>
    %c239_i32 = arith.constant 239 : i32
    %176 = tpu.dynamic_rotate %80 by %c239_i32 dim 1 : vector<1x256xf32>, i32 -> vector<1x256xf32>
    %c239_i32_52 = arith.constant 239 : i32
    %177 = tpu.dynamic_rotate %82 by %c239_i32_52 dim 1 : vector<1x256xf32>, i32 -> vector<1x256xf32>
    %c8 = arith.constant 8 : index
    %178 = memref.load %arg6[%c8] : memref<18xf32, #tpu.memory_space<smem>>
    %179 = vector.broadcast %178 : f32 to vector<1x256xf32>
    %180 = arith.mulf %179, %176 : vector<1x256xf32>
    %c17 = arith.constant 17 : index
    %181 = memref.load %arg6[%c17] : memref<18xf32, #tpu.memory_space<smem>>
    %182 = vector.broadcast %181 : f32 to vector<1x256xf32>
    %183 = arith.mulf %182, %177 : vector<1x256xf32>
    %184 = arith.addf %180, %183 : vector<1x256xf32>
    %cst_53 = arith.constant 0.000000e+00 : f32
    %185 = vector.broadcast %cst_53 : f32 to vector<1x256xf32>
    %186 = arith.select %49, %184, %185 : vector<1x256xi1>, vector<1x256xf32>
    %187 = arith.addf %175, %186 : vector<1x256xf32>
    %188 = arith.negf %187 : vector<1x256xf32>
    %189 = math.exp %188 : vector<1x256xf32>
    %cst_54 = arith.constant 1.000000e+00 : f32
    %190 = vector.broadcast %cst_54 : f32 to vector<1x256xf32>
    %191 = arith.addf %190, %189 : vector<1x256xf32>
    %192 = arith.divf %190, %191 : vector<1x256xf32>
    %193 = vector.broadcast %192 : vector<1x256xf32> to vector<32x256xf32>
    %194 = arith.mulf %76, %193 : vector<32x256xf32>
    %c0_55 = arith.constant 0 : index
    %c0_56 = arith.constant 0 : index
    %c0_57 = arith.constant 0 : index
    %195 = vector.load %arg8[%c0_55, %c0_56, %c0_57] : memref<1x32x256xf32, #tpu.memory_space<vmem>>, vector<1x32x256xf32>
    %196 = vector.shape_cast %195 : vector<1x32x256xf32> to vector<32x256xf32>
    %197 = vector.shape_cast %194 : vector<32x256xf32> to vector<1x32x256xf32>
    tpu.vector_store %arg8[%c0_55, %c0_56, %c0_57], %197 {strides = array<i32>} : memref<1x32x256xf32, #tpu.memory_space<vmem>>, vector<1x32x256xf32>,
    return
  }
  func.func @transform_0(%arg0: i32) -> (i32, i32, i32) {
    %c0_i32 = arith.constant 0 : i32
    %c0_i32_0 = arith.constant 0 : i32
    %c0_i32_1 = arith.constant 0 : i32
    return %arg0, %c0_i32, %c0_i32_0 : i32, i32, i32
  }
  func.func @transform_1(%arg0: i32) -> (i32, i32) {
    %c0_i32 = arith.constant 0 : i32
    %c0_i32_0 = arith.constant 0 : i32
    %c0_i32_1 = arith.constant 0 : i32
    return %c0_i32, %c0_i32_0 : i32, i32
  }
  func.func @transform_2(%arg0: i32) -> (i32, i32) {
    %c0_i32 = arith.constant 0 : i32
    %c0_i32_0 = arith.constant 0 : i32
    %c0_i32_1 = arith.constant 0 : i32
    return %c0_i32, %c0_i32_0 : i32, i32
  }
  func.func @transform_3(%arg0: i32) -> (i32, i32) {
    %c0_i32 = arith.constant 0 : i32
    %c0_i32_0 = arith.constant 0 : i32
    %c0_i32_1 = arith.constant 0 : i32
    return %c0_i32, %c0_i32_0 : i32, i32
  }
  func.func @transform_4(%arg0: i32) -> (i32, i32) {
    %c0_i32 = arith.constant 0 : i32
    %c0_i32_0 = arith.constant 0 : i32
    %c0_i32_1 = arith.constant 0 : i32
    return %c0_i32, %c0_i32_0 : i32, i32
  }
  func.func @transform_5(%arg0: i32) -> i32 {
    %c0_i32 = arith.constant 0 : i32
    %c0_i32_0 = arith.constant 0 : i32
    return %c0_i32 : i32
  }
  func.func @transform_6(%arg0: i32) -> i32 {
    %c0_i32 = arith.constant 0 : i32
    %c0_i32_0 = arith.constant 0 : i32
    return %c0_i32 : i32
  }
  func.func @transform_7(%arg0: i32) -> (i32, i32, i32) {
    %c0_i32 = arith.constant 0 : i32
    %c0_i32_0 = arith.constant 0 : i32
    %c0_i32_1 = arith.constant 0 : i32
    return %arg0, %c0_i32, %c0_i32_0 : i32, i32, i32
  }
}

</mosaic_0001>

<bundles_post_ra>
// kernel: tpu_custom_call.1
= control target key start
LH: loop header
LB: loop body
LE: loop exit
PB: predicated region body
PF: predicated region fallthrough
CT: control target
= control target key end

     0   :  { %s2017_s0 = inlined_call_operand.hbm [shape: f32[2,32,256], index: 0, kind: input, shape index: {}]   ;;  %s2018_s1 = inlined_call_operand.vmem [shape: f32[2,32], index: 1, kind: input, shape index: {}]   ;;  %s2019_s2 = inlined_call_operand.vmem [shape: f32[2,1], index: 2, kind: input, shape index: {}]   ;;  %s2020_s3 = inlined_call_operand.vmem [shape: f32[32,2], index: 3, kind: input, shape index: {}]   ;;  %s2021_s4 = inlined_call_operand.vmem [shape: f32[32,1], index: 4, kind: input, shape index: {}]   ;;  %s2022_s5 = inlined_call_operand.vmem [shape: f32[18], index: 5, kind: input, shape index: {}]   ;;  %s2023_s6 = inlined_call_operand.<no memory space> [shape: f32[1], index: 6, kind: input, shape index: {}]   ;;  %s2024_s7 = inlined_call_operand.hbm [shape: f32[2,32,256], index: 7, kind: output, shape index: {}]  }
   0x1   :  { %2029 = sst [smem:[#allocation12_spill]] %s2022_s5 }
   0x2   :  { %12 = sst [smem:[#allocation2]] %s2023_s6 }
   0x3   :  { %13 = vsyncpa [#allocation4], 0 }
   0x4   :  { %15 = vsyncpa [#allocation4 + $0x1], 0 }
   0x5   :  { %16 = vsyncpa [#allocation6], 0 }
   0x6   :  { %17 = vsyncpa [#allocation5], 0 }
   0x7   :  { %19 = vsyncpa [#allocation5 + $0x1], 0  ;;  %s1431_s26 = smov 0   ;;  %s1433_s27 = smov 0  }
   0x8   :  { %s1435_s28 = smov 0   ;;  %s1437_s29 = smov 0  }
   0x9 LB: > { %s1452_s6 = sadd.s32 4294967295, %s1369_s29   ;;  %s1085_s30 = sadd.s32 4294967294, %s1369_s29   ;;  %s1369_s29 = sphi %s1437_s29, %s2062_s29   ;;  %s1365_s28 = sphi %s1435_s28, %s2061_s28   ;;  %s1361_s27 = sphi %s1433_s27, %s2060_s27   ;;  %s1357_s26 = sphi %s1431_s26, %s2059_s26  }
   0xa   : > { %s1456_s8 = sadd.s32 1, %s1369_s29   ;;  %s32_s9 = sadd.s32 1, %s1365_s28 }
   0xb   : > { %s29_s10 = ssub.s32 %s1369_s29, %s1456_s8  ;;  %p39_p0 = scmp.ne.s32.totalorder %s1365_s28, %s1361_s27 }
   0xc   : > { %p30_p1 = scmp.eq.s32.totalorder %s29_s10, 0  ;;  %p40_p2 = scmp.eq.s32.totalorder %s1369_s29, 0 }
   0xd   : > { %p45_p3 = scmp.ne.s32.totalorder %s1361_s27, %s1357_s26  ;;  %p2026_p4 = scmp.eq.s32.totalorder %s1452_s6, 0 }
   0xe   : > { %s1468_s11 = scalar_select %p30_p1, %s1365_s28, %s32_s9  }
   0xf   : > { %p1470_p5 = por %p40_p2, %p39_p0  ;;  %p1476_p6 = por %p2026_p4, %p45_p3 }
  0x10   : > { %p195_p7 = scmp.eq.s32.totalorder %s1452_s6, 1  ;;  %p201_p8 = scmp.eq.s32.totalorder %s1085_s30, 1 }
  0x11   : > { %s2031_s13 = scalar_select %p1476_p6, 1, 0 }
  0x12   : > { %p1086_p9 = scmp.ge.s32.totalorder %s1369_s29, 1  ;;  %p208_p10 = scmp.lt.s32.totalorder %s1369_s29, 3 }
  0x13   : > { %p1483_p11 = por %p195_p7, %p39_p0  ;;  %p1487_p12 = por %p201_p8, %p45_p3 }
  0x14   : > { %p1491_p13 = pnand %p1086_p9, %p208_p10  ;;  %s2035_s5 = sld [smem:[#allocation12_spill]] }
  0x15   : > { %s2032_s14 = scalar_select %p1483_p11, 1, 0 }
  0x16   : > { %s2033_s15 = scalar_select %p1487_p12, 1, 0 }
  0x17   : > { %s2034_s16 = scalar_select %p1491_p13, 1, 0 }
  0x18   : > { %p1169_p1 = pneg %p1491_p13  ;;  %p1182_p2 = scmp.lt.s32.totalorder %s1369_s29, 2 }
  0x19   : > { %s247_s21 = sand.u32 1, %s1365_s28  }
  0x1a   : > { %s233_s19 = sshll.u32 %s2035_s5, 4  ;;  %p1504_p7 = pnand %p1169_p1, %p2026_p4  ;;  %s234_s19 = int_to_ptr.vmem [resolvable:$true] %s233_s19 }
  0x1b   : > { %p1511_p3 = pnand %p1182_p2, %p1470_p5  ;;  %s1089_s23 = sshll.u32 %s247_s21, 6 }
  0x1c   : > { %s1258_s24 = scalar_lea.vmem %s234_s19, 16  ;;  %p1260_p9 = pneg %p1504_p7 }
  0x1d   : > { %p1259_p8 = scmp.ne.s32.totalorder %s234_s19, %s1258_s24  ;;  %p1266_p12 = scmp.lt.s32.totalorder %s234_s19, %s234_s19 }
  0x1e   : > { %p1267_p11 = scmp.lt.s32.totalorder %s1258_s24, %s1258_s24 }
  0x1f   : > { %p1261_p10 = pnand %p1260_p9, %p1259_p8 }
  0x20   : > { %p1268_p1 = por %p1267_p11, %p1266_p12 }
  0x21   : > { %p1262_p0 = pneg %p1261_p10 }
  0x23   : > { %p1269_p4 = pnand %p1268_p1, %p1262_p0 }
  0x25   : > { %1272 = shalt.err (!%p1269_p4)
}
  0x26   : > { %s1371_s25 = smov [#allocation7]   ;;  %s1130_s30 = sshll.u32 %s1369_s29, 10 }
  0x27   : > { %1172 = dma.vmem_to_smem (!%p1504_p7), %s234_s19, 16, %s1371_s25, [#allocation6]  }
  0x28   : > { %s251_s9 = scalar_lea.vmem [#allocation3], %s1089_s23  ;;  %s1523_s18 = scalar_lea.hbm %s2017_s0, %s1130_s30 }
  0x29   : > { %s258_s10 = sshll.u32 %s251_s9, 4  ;;  %s1527_s24 = scalar_lea.sflag [#allocation4], %s247_s21  ;;  %s1525_s10 = int_to_ptr.vmem [resolvable:$true] %s258_s10 }
  0x2a   : > { %s1273_s5 = scalar_lea.hbm %s1523_s18, 1024  ;;  %p1275_p5 = pneg %p1511_p3 }
  0x2b   : > { %p1274_p4 = scmp.ne.s32.totalorder %s1523_s18, %s1273_s5  ;;  %s1278_s23 = scalar_lea.hbm %s2017_s0, 2048 }
  0x2c   : > { %p1279_p0 = scmp.lt.s32.totalorder %s1523_s18, %s2017_s0  ;;  %p1280_p2 = scmp.lt.s32.totalorder %s1278_s23, %s1273_s5 }
  0x2d   : > { %p1276_p11 = pnand %p1275_p5, %p1274_p4 }
  0x2e   : > { %p1281_p7 = por %p1280_p2, %p1279_p0 }
  0x2f   : > { %p1277_p12 = pneg %p1276_p11 }
  0x31   : > { %p1282_p8 = pnand %p1281_p7, %p1277_p12 }
  0x33   : > { %1285 = shalt.err (!%p1282_p8)
}
  0x34   : > { %s1286_s21 = scalar_lea.vmem %s1525_s10, 1024  ;;  %s1372_s9 = smov [#allocation3]  }
  0x35   : > { %p1287_p9 = scmp.ne.s32.totalorder %s1525_s10, %s1286_s21  ;;  %s1291_s12 = sshll.u32 %s1372_s9, 4  ;;  %s1292_s12 = int_to_ptr.vmem [resolvable:$false] %s1291_s12 }
  0x36   : > { %s1293_s17 = scalar_lea.vmem %s1292_s12, 2048  ;;  %p1294_p4 = scmp.lt.s32.totalorder %s1525_s10, %s1292_s12 }
  0x37   : > { %p1289_p10 = pnand %p1287_p9, %p1275_p5  ;;  %p1295_p11 = scmp.lt.s32.totalorder %s1293_s17, %s1286_s21 }
  0x39   : > { %p1290_p1 = pneg %p1289_p10  ;;  %p1296_p6 = por %p1295_p11, %p1294_p4 }
  0x3b   : > { %p1297_p13 = pnand %p1296_p6, %p1290_p1 }
  0x3d   : > { %1300 = shalt.err (!%p1297_p13)
}
  0x3e   : > { %s1373_s5 = smov 256   ;;  %s1374_s19 = smov 16  }
  0x3f   : > { %1176 = dma.hbm_to_vmem [thread:$0]  (!%p1511_p3), %s1523_s18, 1024, %s1525_s10, %s1527_s24, %s1373_s5, %s1373_s5, %s1374_s19  }
  0x40   : > { %p2038_p5 = scmp.ne.s32.totalorder %s2034_s16, 0 }
  0x41   : > { %s1551_s20 = sand.u32 (!%p2038_p5), 1, %s1361_s27   ;;  %p2039_p6 = scmp.ne.s32.totalorder (!%p2038_p5), %s2031_s13, 0 }
  0x42   : > { %270 = sbr.rel (%p2038_p5) target bundleno = 1168 (0x490), region = 48  ;;  %s1093_s23 = sshll.u32 (!%p2038_p5), %s1551_s20, 6 }
  0x43   : > { %s273_s25 = scalar_lea.sflag (!%p2038_p5), [#allocation4], %s1551_s20  ;;  %s276_s30 = scalar_lea.vmem (!%p2038_p5), [#allocation3], %s1093_s23 }
  0x47   : > { %1344 = dma.done.wait (%p2039_p6), %s273_s25, 1024  }
  0x48   : > { %1346 = vsyncadd (%p2039_p6), %s273_s25, 4294966272  ;;  %p2040_p13 = scmp.eq.s32.totalorder %s1452_s6, 0 }
  0x4a   : > { %1348 = dma.done.wait (%p2040_p13), [#allocation6], 16   ;;  %p2041_p3 = pmov %p2040_p13 }
  0x4c   : > { %1350 = vsyncadd (%p2041_p3), [#allocation6], 4294967280 }
  0x4d   : > { %285 = sfence }
  0x4e   : > { %v1565_v0 = vld [vmem:[%s276_s30 + $0x30] sm:$0xff]  ;;  %v1567_v1 = vld [vmem:[%s276_s30 + $0x38] sm:$0xff]  ;;  %v1569_v2 = vld [vmem:[%s276_s30 + $0x20] sm:$0xff]  ;;  %v1375_v16 = vmov 0.0   ;;  %vm1376_vm0 = vmmov 0   ;;  %v1377_v17 = vmov 0  }
  0x4f   : > { %v400_v3 = vmax.f32 %v1565_v0, %v1567_v1  ;;  %v383_v4 = vadd.f32 %v1567_v1, %v1565_v0  ;;  %v1575_v5 = vld [vmem:[%s276_s30 + $0x28] sm:$0xff]  ;;  %v1577_v6 = vld [vmem:[%s276_s30 + $0x10] sm:$0xff]  ;;  %v1579_v7 = vld [vmem:[%s276_s30 + $0x18] sm:$0xff]  ;;  %1142 = vmatprep.subr.mxu0 %v1375_v16  ;;  %1150 = vmatprep.mubr.msk.f32.mxu0 %vm1376_vm0, %v1375_v16  ;;  %vm403_vm1 = vcmask 7168   ;;  %vm413_vm2 = vcmask 261120   ;;  %s1378_s21 = smov 127  }
  0x50   : > { %v380_v8 = vadd.f32 %v1575_v5, %v1569_v2  ;;  %v377_v9 = vadd.f32 %v1579_v7, %v1577_v6  ;;  %v1585_v10 = vld [vmem:[%s276_s30] sm:$0xff]  ;;  %v1587_v11 = vld [vmem:[%s276_s30 + $0x8] sm:$0xff]  ;;  %v397_v12 = vmax.f32 %v1569_v2, %v1575_v5  ;;  %v394_v14 = vmax.f32 %v1577_v6, %v1579_v7  ;;  %1232 = vset.pattern.permute.xlu0 %v1377_v17  ;;  %v320_v39 = vld [vmem:[%s2021_s4 + $0x10] sm:$0xff]  ;;  %s1113_s9 = sld [smem:[#allocation7 + $0x4]]  ;;  %s1379_s17 = smov 17  }
  0x51   : > { %401 = vmax.xlane.f32.xlu1 %v400_v3  ;;  %384 = vadd.xlane.f32.xlu0 %v383_v4  ;;  %v374_v13 = vadd.f32 %v1587_v11, %v1585_v10  ;;  %v391_v15 = vmax.f32 %v1585_v10, %v1587_v11  ;;  %v313_v18 = vld [vmem:[%s2019_s2] sm:$0x3]  ;;  %vm508_vm3 = vcmask 15360   ;;  %v319_v38 = vld [vmem:[%s2021_s4 + $0x8] sm:$0xff]  ;;  %v321_v40 = vld [vmem:[%s2021_s4 + $0x18] sm:$0xff]  ;;  %vm521_vm4 = vcmask 1041408  }
  0x52   : > { %1233 = vset.pattern.permute.xlu1 %v1377_v17  ;;  %v312_v34 = vld [vmem:[%s2018_s1] sm:$0x3]  ;;  %v315_v46 = vld [vmem:[%s2020_s3 + $0x8] sm:$0xff]  ;;  %v316_v47 = vld [vmem:[%s2020_s3 + $0x10] sm:$0xff]  ;;  %s1114_s12 = sld [smem:[#allocation7 + $0xd]]  ;;  %s1380_s5 = smov 16  }
  0x53   : > { %v314_v36 = vld [vmem:[%s2020_s3] sm:$0xff]  ;;  %v317_v48 = vld [vmem:[%s2020_s3 + $0x18] sm:$0xff]  ;;  %s1381_s19 = smov 15   ;;  %s1382_s25 = smov 1  }
  0x54   : > { %1155 = vmatprep.mubr.msk.f32.mxu1 %vm508_vm3, %v314_v36  ;;  %v318_v37 = vld [vmem:[%s2021_s4] sm:$0xff]  ;;  %s1383_s30 = smov 113   ;;  %s1384_s13 = smov 112  }
  0x55   : > { %381 = vadd.xlane.f32.xlu0 %v380_v8  ;;  %378 = vadd.xlane.f32.xlu1 %v377_v9  ;;  %s1385_s16 = smov 111   ;;  %s1707_s22 = sld [smem:[#allocation7 + $0x9]] }
  0x56   : > { %s1709_s10 = sld [smem:[#allocation7 + $0xa]]  ;;  %p2056_p0 = scmp.ne.s32.totalorder %s2032_s14, 0 }
  0x57   : > { %s1711_s18 = sld [smem:[#allocation7 + $0xb]] }
  0x58   : > { %s1713_s24 = sld [smem:[#allocation7 + $0xc]] }
  0x59   : > { %398 = vmax.xlane.f32.xlu0 %v397_v12  ;;  %375 = vadd.xlane.f32.xlu1 %v374_v13 }
  0x5d   : > { %395 = vmax.xlane.f32.xlu0 %v394_v14  ;;  %392 = vmax.xlane.f32.xlu1 %v391_v15 }
  0x6e   : > { %490 = vperm.xlu1 %1233, %v318_v37  }
  0x72   : > { %495 = vperm.xlu1 %1233, %v319_v38  }
  0x73   : > { %410 = vperm.xlu0 %1232, %v313_v18  }
  0x76   : > { %500 = vperm.xlu1 %1233, %v320_v39  }
  0x7a   : > { %505 = vperm.xlu1 %1233, %v321_v40  }
  0xda   : > { %v402_v19 = vpop.xlane.xlu1 %401  ;;  %v385_v20 = vpop.xlane.xlu0 %384 }
  0xdb   : > { %v390_v21 = vmul.f32 0.00390625, %v385_v20 }
  0xdd   : > { %v407_v22 = vsel %vm403_vm1, %v390_v21, %v402_v19 }
  0xde   : > { %1143 = vmatpush3.msra.mxu0 %v407_v22  ;;  %v382_v23 = vpop.xlane.xlu0 %381  ;;  %v379_v24 = vpop.xlane.xlu1 %378 }
  0xdf   : > { %1144 = vmatprep.subr.mxu0 %v1375_v16  ;;  %v389_v25 = vmul.f32 0.00390625, %v382_v23  ;;  %v388_v29 = vmul.f32 0.00390625, %v379_v24 }
  0xe2   : > { %v399_v26 = vpop.xlane.xlu0 %398  ;;  %v376_v27 = vpop.xlane.xlu1 %375 }
  0xe3   : > { %v406_v28 = vsel %vm403_vm1, %v389_v25, %v399_v26  ;;  %v387_v30 = vmul.f32 0.00390625, %v376_v27 }
  0xe4   : > { %1145 = vmatpush3.msra.mxu0 %v406_v28 }
  0xe5   : > { %1146 = vmatprep.subr.mxu0 %v1375_v16 }
  0xe6   : > { %v396_v31 = vpop.xlane.xlu0 %395  ;;  %v393_v32 = vpop.xlane.xlu1 %392 }
  0xe7   : > { %v405_v33 = vsel %vm403_vm1, %v388_v29, %v396_v31  ;;  %v404_v35 = vsel %vm403_vm1, %v387_v30, %v393_v32 }
  0xe8   : > { %1147 = vmatpush3.msra.mxu0 %v405_v33 }
  0xe9   : > { %1148 = vmatprep.subr.mxu0 %v1375_v16 }
  0xea   : > { %1149 = vmatpush3.msra.mxu0 %v404_v35  ;;  %v491_v49 = vpop.permute.xlu1 %490 }
  0xeb   : > { %1151 = vmatmul.mubr.msk.f32.vlgmr.msra.gmra.mxu0 %vm413_vm2, %v312_v34 }
  0xee   : > { %v411_v41 = vpop.permute.xlu0 %410  ;;  %v496_v50 = vpop.permute.xlu1 %495 }
  0xf2   : > { %v501_v56 = vpop.permute.xlu1 %500 }
  0xf6   : > { %v506_v59 = vpop.permute.xlu1 %505 }
 0x1ab   : > { %v483_v42 = vpop.f32.mrf.mxu0 }
 0x1ac   : > { %v484_v43 = vadd.f32 %v483_v42, %v411_v41 }
 0x1ad   : > { %v1152_v44 = vpop.f32.mrf.mxu0 }
 0x1ae   : > { %v487_v45 = vmax.f32 %v484_v43, 0.0 }
 0x1b0   : > { %1153 = vmatprep.subr.msk.mxu1 %vm521_vm4, %v487_v45 }
 0x1b1   : > { %1154 = vmatpush3.msk.msra.mxu1 %vm521_vm4, %v487_v45 }
 0x1b2   : > { %1156 = vmatmul.mubr.msk.f32.vlgmr.msra.gmra.mxu1 %vm508_vm3, %v315_v46 }
 0x1b3   : > { %1158 = vmatprep.mubr.msk.f32.mxu1 %vm508_vm3, %v316_v47 }
 0x1b6   : > { %1159 = vmatmul.mubr.msk.f32.gmra.mxu1 %vm508_vm3, %v317_v48 }
 0x272   : > { %v1157_v51 = vpop.f32.mrf.mxu1 }
 0x273   : > { %v597_v52 = vadd.f32 %v1157_v51, %v496_v50 }
 0x274   : > { %v591_v53 = vpop.f32.mrf.mxu1 }
 0x275   : > { %616 = vrot.lane.b32.xlu1 %v597_v52, %s1378_s21  ;;  %v592_v55 = vadd.f32 %v591_v53, %v491_v49 }
 0x276   : > { %v1160_v54 = vpop.f32.mrf.mxu1 }
 0x277   : > { %v607_v60 = vadd.f32 %v1160_v54, %v506_v59 }
 0x278   : > { %v601_v57 = vpop.f32.mrf.mxu1 }
 0x279   : > { %614 = vrot.lane.b32.xlu1 %v592_v55, %s1378_s21  ;;  %v602_v58 = vadd.f32 %v601_v57, %v501_v56 }
 0x27d   : > { %618 = vrot.lane.b32.xlu1 %v602_v58, %s1378_s21 }
 0x281   : > { %620 = vrot.lane.b32.xlu1 %v607_v60, %s1378_s21 }
 0x2e7   : > { %v617_v61 = vpop.permute.xlu1 %616 }
 0x2e8   : > { %v627_v62 = vadd.f32 %v617_v61, %v597_v52 }
 0x2ea   : > { %v1103_v63 = vmul.f32 -1.442695, %v627_v62 }
 0x2eb   : > { %v615_v3 = vpop.permute.xlu1 %614 }
 0x2ec   : > { %1234 = vpow2.f32 %v1103_v63  ;;  %v626_v4 = vadd.f32 %v615_v3, %v592_v55 }
 0x2ee   : > { %v1102_v8 = vmul.f32 -1.442695, %v626_v4 }
 0x2ef   : > { %v619_v9 = vpop.permute.xlu1 %618 }
 0x2f0   : > { %1236 = vpow2.f32 %v1102_v8  ;;  %v628_v12 = vadd.f32 %v619_v9, %v602_v58  ;;  %v831_v9 = vstv %s1113_s9  ;;  %s1721_s9 = sld [smem:[#allocation7 + $0xe]] }
 0x2f2   : > { %v1104_v13 = vmul.f32 -1.442695, %v628_v12  ;;  %v835_v12 = vstv %s1114_s12  ;;  %s1723_s12 = sld [smem:[#allocation7 + $0xf]] }
 0x2f3   : > { %v621_v14 = vpop.permute.xlu1 %620 }
 0x2f4   : > { %1238 = vpow2.f32 %v1104_v13  ;;  %v629_v15 = vadd.f32 %v621_v14, %v607_v60 }
 0x2f6   : > { %v1105_v16 = vmul.f32 -1.442695, %v629_v15 }
 0x2f8   : > { %1240 = vpow2.f32 %v1105_v16 }
 0x2f9   : > { %v1235_v17 = vpop.eup %1234 }
 0x2fa   : > { %v643_v18 = vadd.f32 1.0, %v1235_v17 }
 0x2fc   : > { %1242 = vrcp.f32 %v643_v18 }
 0x2fd   : > { %v1237_v19 = vpop.eup %1236 }
 0x2fe   : > { %v642_v20 = vadd.f32 1.0, %v1237_v19 }
 0x300   : > { %1244 = vrcp.f32 %v642_v20 }
 0x301   : > { %v1239_v21 = vpop.eup %1238 }
 0x302   : > { %v644_v22 = vadd.f32 1.0, %v1239_v21 }
 0x304   : > { %1246 = vrcp.f32 %v644_v22 }
 0x305   : > { %v1241_v23 = vpop.eup %1240 }
 0x306   : > { %v645_v24 = vadd.f32 1.0, %v1241_v23 }
 0x308   : > { %1248 = vrcp.f32 %v645_v24 }
 0x309   : > { %v1243_v25 = vpop.eup %1242 }
 0x30a   : > { %661 = vperm.xlu1 %1233, %v1243_v25  }
 0x30d   : > { %v1245_v26 = vpop.eup %1244 }
 0x30e   : > { %656 = vperm.xlu0 %1232, %v1245_v26  }
 0x311   : > { %v1247_v27 = vpop.eup %1246 }
 0x312   : > { %666 = vperm.xlu0 %1232, %v1247_v27  }
 0x315   : > { %v1249_v28 = vpop.eup %1248 }
 0x316   : > { %671 = vperm.xlu1 %1233, %v1249_v28  }
 0x385   : > { %v662_v30 = vpop.permute.xlu1 %661 }
 0x386   : > { %v1646_v34 = vmul.f32 %v662_v30, %v1577_v6  ;;  %v1649_v35 = vmul.f32 %v662_v30, %v1579_v7 }
 0x389   : > { %v657_v29 = vpop.permute.xlu0 %656 }
 0x38a   : > { %v1640_v31 = vmul.f32 %v657_v29, %v1585_v10  ;;  %v1643_v32 = vmul.f32 %v657_v29, %v1587_v11 }
 0x38c   : > { %v682_v10 = vadd.f32 %v1646_v34, %v1640_v31  ;;  %v691_v11 = vadd.f32 %v1649_v35, %v1643_v32 }
 0x38d   : > { %v667_v33 = vpop.permute.xlu0 %666 }
 0x38e   : > { %v1652_v36 = vmul.f32 %v667_v33, %v1569_v2  ;;  %v1655_v37 = vmul.f32 %v667_v33, %v1575_v5 }
 0x390   : > { %v683_v39 = vadd.f32 %v682_v10, %v1652_v36  ;;  %v692_v6 = vadd.f32 %v691_v11, %v1655_v37  ;;  %v703_v5 = vmax.f32 %v1640_v31, %v1652_v36  ;;  %v712_v40 = vmax.f32 %v1643_v32, %v1655_v37 }
 0x391   : > { %v672_v38 = vpop.permute.xlu1 %671  ;;  %v323_v11 = vlaneseq }
 0x392   : > { %v1664_v7 = vmul.f32 %v672_v38, %v1565_v0  ;;  %v1667_v2 = vmul.f32 %v672_v38, %v1567_v1 }
 0x394   : > { %v684_v41 = vadd.f32 %v683_v39, %v1664_v7  ;;  %v693_v42 = vadd.f32 %v692_v6, %v1667_v2  ;;  %v704_v43 = vmax.f32 %v1646_v34, %v1664_v7  ;;  %v713_v0 = vmax.f32 %v1649_v35, %v1667_v2 }
 0x395   : > { %v1726_v6 = vand.u32 127, %v323_v11 }
 0x396   : > { %v685_v44 = vrot.slane %v684_v41, 4  ;;  %v694_v45 = vrot.slane %v693_v42, 4  ;;  %v705_v1 = vmax.f32 %v703_v5, %v704_v43  ;;  %v714_v46 = vmax.f32 %v712_v40, %v713_v0 }
 0x397   : > { %vm726_vm5 = vcmp.lt.s32.totalorder %v1726_v6, 17  ;;  %vm753_vm6 = vcmp.lt.s32.totalorder %v1726_v6, 16  ;;  %vm780_vm7 = vcmp.lt.s32.totalorder %v1726_v6, 15  ;;  %vm807_vm8 = vcmp.lt.s32.totalorder %v1726_v6, 1 }
 0x398   : > { %v686_v47 = vadd.f32 %v685_v44, %v684_v41  ;;  %v695_v48 = vadd.f32 %v694_v45, %v693_v42  ;;  %v706_v49 = vrot.slane %v705_v1, 4  ;;  %v715_v50 = vrot.slane %v714_v46, 4 }
 0x399   : > { %v1737_v41 = vadd.s32 128, %v1726_v6  ;;  %v740_v42 = vstv %s1707_s22  ;;  %v767_v44 = vstv %s1709_s10  ;;  %vm350_vm9 = vcmp.ge.s32.totalorder %v1726_v6, 16  ;;  %s1851_s22 = sld [smem:[#allocation7 + $0x7]] }
 0x39a   : > { %v687_v51 = vrot.slane %v686_v47, 2  ;;  %v696_v52 = vrot.slane %v695_v48, 2  ;;  %v707_v53 = vmax.f32 %v705_v1, %v706_v49  ;;  %v716_v54 = vmax.f32 %v714_v46, %v715_v50  ;;  %s1856_s10 = sld [smem:[#allocation7 + $0x10]] }
 0x39b   : > { %v794_v46 = vstv %s1711_s18  ;;  %vm846_vm10 = vcmp.lt.s32.totalorder %v1726_v6, 127  ;;  %vm873_vm14 = vcmp.lt.s32.totalorder %v1726_v6, 113  ;;  %vm900_vm2 = vcmp.lt.s32.totalorder %v1726_v6, 112  ;;  %s1891_s18 = sld [smem:[#allocation7 + $0x8]] }
 0x39c   : > { %v688_v55 = vadd.f32 %v687_v51, %v686_v47  ;;  %v697_v56 = vadd.f32 %v696_v52, %v695_v48  ;;  %v708_v57 = vrot.slane %v707_v53, 2  ;;  %v717_v58 = vrot.slane %v716_v54, 2 }
 0x39d   : > { %v330_v47 = vand.u32 15, %v1726_v6  ;;  %v337_v48 = vand.u32 15, %v1737_v41  ;;  %v821_v51 = vstv %s1713_s24  ;;  %v860_v52 = vstv %s1721_s9  ;;  %s1901_s24 = sld [smem:[#allocation7 + $0x11]]  ;;  %s311_s9 = scalar_lea.vmem [#allocation8], %s1093_s23 }
 0x39e   : > { %v689_v59 = vrot.slane %v688_v55, 1  ;;  %v698_v60 = vrot.slane %v697_v56, 1  ;;  %v709_v61 = vmax.f32 %v707_v53, %v708_v57  ;;  %v718_v62 = vmax.f32 %v716_v54, %v717_v58 }
 0x39f   : > { %v887_v54 = vstv %s1723_s12  ;;  %vm1773_vm11 = vcmp.ge.s32.totalorder %v330_v47, 1  ;;  %vm1777_vm12 = vcmp.ge.s32.totalorder %v337_v48, 1  ;;  %vm1782_vm13 = vcmp.lt.s32.totalorder %v330_v47, 15  ;;  %s1000_s12 = sshll.u32 %s311_s9, 4  ;;  %s1973_s12 = int_to_ptr.vmem [resolvable:$true] %s1000_s12 }
 0x3a0   : > { %v690_v63 = vadd.f32 %v689_v59, %v688_v55  ;;  %v699_v3 = vadd.f32 %v698_v60, %v697_v56  ;;  %v710_v4 = vrot.slane %v709_v61, 1  ;;  %v719_v8 = vrot.slane %v718_v62, 1  ;;  %vm1804_vm15 = vmand %vm350_vm9, %vm1773_vm11  ;;  %s1301_s23 = scalar_lea.vmem %s1973_s12, 1024 }
 0x3a1   : > { %vm1818_vm0 = vcmp.lt.s32.totalorder %v337_v48, 15  ;;  %vm1847_vm1 = vmand %vm350_vm9, %vm1782_vm13  ;;  %vm361_vm3 = vcmp.lt.s32.totalorder %v1737_v41, 240  ;;  %vm927_vm4 = vcmp.lt.s32.totalorder %v1726_v6, 111  ;;  %p1302_p12 = scmp.ne.s32.totalorder %s1973_s12, %s1301_s23 }
 0x3a2   : > { %v701_v13 = vmul.f32 0.03125, %v690_v63  ;;  %v702_v14 = vmul.f32 0.03125, %v699_v3  ;;  %v711_v15 = vmax.f32 %v709_v61, %v710_v4  ;;  %v720_v16 = vmax.f32 %v718_v62, %v719_v8 }
 0x3a3   : > { %p1303_p2 = pnand %p1302_p12, %p2056_p0 }
 0x3a4   : > { %731 = vrot.lane.b32.xlu1 %v720_v16, %s1379_s17  ;;  %729 = vrot.lane.b32.xlu0 %v711_v15, %s1379_s17  ;;  %v833_v17 = vmul.f32 %v831_v9, %v702_v14  ;;  %v836_v18 = vmul.f32 %v835_v12, %v711_v15  ;;  %v837_v19 = vmul.f32 %v835_v12, %v720_v16 }
 0x3a5   : > { %v832_v20 = vmul.f32 %v831_v9, %v701_v13  ;;  %p1304_p7 = pneg %p1303_p2 }
 0x3a6   : > { %v1679_v21 = vadd.f32 %v837_v19, %v833_v17 }
 0x3a7   : > { %v1681_v22 = vadd.f32 %v836_v18, %v832_v20 }
 0x3a8   : > { %758 = vrot.lane.b32.xlu1 %v720_v16, %s1380_s5  ;;  %756 = vrot.lane.b32.xlu0 %v711_v15, %s1380_s5 }
 0x3ac   : > { %785 = vrot.lane.b32.xlu1 %v720_v16, %s1381_s19  ;;  %783 = vrot.lane.b32.xlu0 %v711_v15, %s1381_s19 }
 0x3b0   : > { %812 = vrot.lane.b32.xlu1 %v720_v16, %s1382_s25  ;;  %810 = vrot.lane.b32.xlu0 %v711_v15, %s1382_s25 }
 0x3b4   : > { %851 = vrot.lane.b32.xlu1 %v720_v16, %s1378_s21  ;;  %849 = vrot.lane.b32.xlu0 %v711_v15, %s1378_s21 }
 0x3b8   : > { %878 = vrot.lane.b32.xlu1 %v720_v16, %s1383_s30  ;;  %876 = vrot.lane.b32.xlu0 %v711_v15, %s1383_s30 }
 0x3bc   : > { %905 = vrot.lane.b32.xlu1 %v720_v16, %s1384_s13  ;;  %903 = vrot.lane.b32.xlu0 %v711_v15, %s1384_s13 }
 0x3c0   : > { %724 = vrot.lane.b32.xlu1 %v702_v14, %s1379_s17  ;;  %722 = vrot.lane.b32.xlu0 %v701_v13, %s1379_s17  ;;  %s1732_s17 = sld [smem:[#allocation7 + $0x1]] }
 0x3c4   : > { %751 = vrot.lane.b32.xlu1 %v702_v14, %s1380_s5  ;;  %749 = vrot.lane.b32.xlu0 %v701_v13, %s1380_s5 }
 0x3c6   : > { %v763_v57 = vstv %s1732_s17 }
 0x3c8   : > { %778 = vrot.lane.b32.xlu1 %v702_v14, %s1381_s19  ;;  %776 = vrot.lane.b32.xlu0 %v701_v13, %s1381_s19  ;;  %s1734_s19 = sld [smem:[#allocation2]] }
 0x3cc   : > { %805 = vrot.lane.b32.xlu1 %v702_v14, %s1382_s25  ;;  %803 = vrot.lane.b32.xlu0 %v701_v13, %s1382_s25  ;;  %s1739_s25 = sld [smem:[#allocation7 + $0x2]] }
 0x3ce   : > { %v721_v4 = vstv %s1734_s19 }
 0x3d0   : > { %844 = vrot.lane.b32.xlu1 %v702_v14, %s1378_s21  ;;  %842 = vrot.lane.b32.xlu0 %v701_v13, %s1378_s21  ;;  %s1719_s21 = sld [smem:[#allocation7]] }
 0x3d4   : > { %871 = vrot.lane.b32.xlu1 %v702_v14, %s1383_s30  ;;  %869 = vrot.lane.b32.xlu0 %v701_v13, %s1383_s30  ;;  %s1754_s30 = sld [smem:[#allocation7 + $0x3]] }
 0x3d6   : > { %v736_v45 = vstv %s1719_s21  ;;  %s1131_s21 = sshll.u32 %s1452_s6, 10  ;;  %s987_s6 = scalar_lea.sflag [#allocation5], %s1551_s20 }
 0x3d8   : > { %898 = vrot.lane.b32.xlu1 %v702_v14, %s1384_s13  ;;  %896 = vrot.lane.b32.xlu0 %v701_v13, %s1384_s13  ;;  %s1787_s13 = sld [smem:[#allocation7 + $0x5]] }
 0x3dc   : > { %925 = vrot.lane.b32.xlu1 %v702_v14, %s1385_s16  ;;  %923 = vrot.lane.b32.xlu0 %v701_v13, %s1385_s16  ;;  %v790_v13 = vstv %s1739_s25  ;;  %s1967_s25 = scalar_lea.hbm %s2024_s7, %s1131_s21 }
 0x3e0   : > { %932 = vrot.lane.b32.xlu1 %v720_v16, %s1385_s16  ;;  %930 = vrot.lane.b32.xlu0 %v711_v15, %s1385_s16  ;;  %s1823_s16 = sld [smem:[#allocation7 + $0x6]] }
 0x416   : > { %v732_v23 = vpop.permute.xlu1 %731  ;;  %v730_v24 = vpop.permute.xlu0 %729 }
 0x417   : > { %v734_v50 = vsel %vm726_vm5, %v732_v23, %v730_v24  ;;  %v733_v53 = vsel %vm726_vm5, %v730_v24, %v732_v23 }
 0x418   : > { %v741_v62 = vmul.f32 %v740_v42, %v734_v50  ;;  %v742_v8 = vmul.f32 %v740_v42, %v733_v53 }
 0x41a   : > { %v1691_v25 = vpop.permute.xlu1 %758  ;;  %v1693_v26 = vpop.permute.xlu0 %756 }
 0x41b   : > { %v761_v59 = vsel %vm753_vm6, %v1691_v25, %v1693_v26  ;;  %v760_v42 = vsel %vm753_vm6, %v1693_v26, %v1691_v25 }
 0x41c   : > { %v768_v14 = vmul.f32 %v767_v44, %v761_v59 }
 0x41e   : > { %v1695_v27 = vpop.permute.xlu1 %785  ;;  %v1697_v28 = vpop.permute.xlu0 %783 }
 0x41f   : > { %v787_v15 = vsel %vm780_vm7, %v1697_v28, %v1695_v27  ;;  %v788_v16 = vsel %vm780_vm7, %v1695_v27, %v1697_v28 }
 0x420   : > { %v796_v53 = vmul.f32 %v794_v46, %v787_v15 }
 0x422   : > { %v1699_v29 = vpop.permute.xlu1 %812  ;;  %v1701_v30 = vpop.permute.xlu0 %810 }
 0x423   : > { %v815_v47 = vsel %vm807_vm8, %v1699_v29, %v1701_v30  ;;  %v814_v25 = vsel %vm807_vm8, %v1701_v30, %v1699_v29 }
 0x424   : > { %v822_v29 = vmul.f32 %v821_v51, %v815_v47 }
 0x426   : > { %v1703_v33 = vpop.permute.xlu1 %851  ;;  %v1705_v10 = vpop.permute.xlu0 %849 }
 0x42a   : > { %v1715_v38 = vpop.permute.xlu1 %878  ;;  %v1717_v39 = vpop.permute.xlu0 %876 }
 0x42e   : > { %v1728_v5 = vpop.permute.xlu1 %905  ;;  %v1730_v40 = vpop.permute.xlu0 %903 }
 0x432   : > { %v725_v43 = vpop.permute.xlu1 %724  ;;  %v723_v0 = vpop.permute.xlu0 %722 }
 0x433   : > { %v728_v1 = vsel %vm726_vm5, %v725_v43, %v723_v0  ;;  %v727_v49 = vsel %vm726_vm5, %v723_v0, %v725_v43  ;;  %vm1930_vm5 = vmand %vm361_vm3, %vm1777_vm12 }
 0x434   : > { %v737_v55 = vmul.f32 %v736_v45, %v728_v1  ;;  %v738_v60 = vmul.f32 %v736_v45, %v727_v49  ;;  %v817_v45 = vstv %s1754_s30  ;;  %v795_v1 = vmul.f32 %v794_v46, %v788_v16  ;;  %s1386_s30 = smov [#allocation8]  }
 0x436   : > { %v752_v56 = vpop.permute.xlu1 %751  ;;  %v750_v58 = vpop.permute.xlu0 %749  ;;  %v743_v17 = vadd.f32 %v741_v62, %v737_v55  ;;  %v744_v23 = vadd.f32 %v742_v8, %v738_v60  ;;  %v823_v8 = vmul.f32 %v821_v51, %v814_v25  ;;  %v853_v51 = vsel %vm846_vm10, %v1705_v10, %v1703_v33 }
 0x437   : > { %v755_v61 = vsel %vm753_vm6, %v752_v56, %v750_v58  ;;  %v754_v24 = vsel %vm753_vm6, %v750_v58, %v752_v56  ;;  %v861_v47 = vmul.f32 %v860_v52, %v853_v51  ;;  %v907_v51 = vsel %vm900_vm2, %v1730_v40, %v1728_v5  ;;  %vm365_vm6 = vmand %vm361_vm3, %vm1818_vm0 }
 0x438   : > { %v764_v9 = vmul.f32 %v763_v57, %v755_v61  ;;  %v745_v26 = vsel %vm1804_vm15, %v743_v17, 0.0  ;;  %v765_v48 = vmul.f32 %v763_v57, %v754_v24  ;;  %v746_v58 = vsel %vm1777_vm12, %v744_v23, 0.0 }
 0x439   : > { %v769_v61 = vmul.f32 %v767_v44, %v760_v42  ;;  %v856_v44 = vstv %s1787_s13  ;;  %v748_v15 = vadd.f32 %v746_v58, %v721_v4  ;;  %v854_v42 = vsel %vm846_vm10, %v1703_v33, %v1705_v10  ;;  %s1305_s13 = sshll.u32 %s1386_s30, 4  ;;  %s1306_s13 = int_to_ptr.vmem [resolvable:$false] %s1305_s13 }
 0x43a   : > { %v779_v18 = vpop.permute.xlu1 %778  ;;  %v777_v19 = vpop.permute.xlu0 %776  ;;  %v770_v49 = vadd.f32 %v768_v14, %v764_v9  ;;  %v747_v14 = vadd.f32 %v745_v26, %v721_v4  ;;  %p1308_p8 = scmp.lt.s32.totalorder %s1973_s12, %s1306_s13 }
 0x43b   : > { %v781_v27 = vsel %vm780_vm7, %v777_v19, %v779_v18  ;;  %v782_v28 = vsel %vm780_vm7, %v779_v18, %v777_v19  ;;  %v771_v16 = vadd.f32 %v769_v61, %v765_v48  ;;  %v881_v61 = vsel %vm873_vm14, %v1715_v38, %v1717_v39 }
 0x43c   : > { %v791_v0 = vmul.f32 %v790_v13, %v782_v28  ;;  %v792_v50 = vmul.f32 %v790_v13, %v781_v27  ;;  %v772_v9 = vsel %vm350_vm9, %v770_v49, 0.0  ;;  %v883_v28 = vstv %s1823_s16  ;;  %s1307_s16 = scalar_lea.vmem %s1306_s13, 2048 }
 0x43d   : > { %v774_v4 = vadd.f32 %v772_v9, %v747_v14  ;;  %v880_v49 = vsel %vm873_vm14, %v1717_v39, %v1715_v38  ;;  %v889_v39 = vmul.f32 %v887_v54, %v881_v61  ;;  %p1309_p9 = scmp.lt.s32.totalorder %s1307_s16, %s1301_s23 }
 0x43e   : > { %v806_v55 = vpop.permute.xlu1 %805  ;;  %v804_v56 = vpop.permute.xlu0 %803  ;;  %v797_v59 = vadd.f32 %v795_v1, %v791_v0  ;;  %v798_v13 = vadd.f32 %v796_v53, %v792_v50  ;;  %v775_v50 = vadd.f32 %v771_v16, %v748_v15 }
 0x43f   : > { %v808_v60 = vsel %vm807_vm8, %v804_v56, %v806_v55  ;;  %v809_v46 = vsel %vm807_vm8, %v806_v55, %v804_v56  ;;  %p1310_p10 = por %p1309_p9, %p1308_p8 }
 0x440   : > { %v818_v57 = vmul.f32 %v817_v45, %v809_v46  ;;  %v819_v62 = vmul.f32 %v817_v45, %v808_v60  ;;  %v799_v20 = vsel %vm1847_vm1, %v797_v59, 0.0  ;;  %v800_v0 = vsel %vm1818_vm0, %v798_v13, 0.0 }
 0x441   : > { %v801_v53 = vadd.f32 %v799_v20, %v774_v4  ;;  %v802_v56 = vadd.f32 %v800_v0, %v775_v50  ;;  %v910_v60 = vstv %s1851_s22  ;;  %v862_v46 = vmul.f32 %v860_v52, %v854_v42  ;;  %p1311_p1 = pnand %p1310_p10, %p1304_p7 }
 0x442   : > { %v824_v17 = vadd.f32 %v822_v29, %v818_v57  ;;  %v845_v18 = vpop.permute.xlu1 %844  ;;  %v843_v19 = vpop.permute.xlu0 %842  ;;  %v825_v23 = vadd.f32 %v823_v8, %v819_v62  ;;  %v888_v29 = vmul.f32 %v887_v54, %v880_v49  ;;  %v914_v57 = vstv %s1856_s10 }
 0x443   : > { %v847_v24 = vsel %vm846_vm10, %v843_v19, %v845_v18  ;;  %v848_v27 = vsel %vm846_vm10, %v845_v18, %v843_v19  ;;  %v908_v62 = vsel %vm900_vm2, %v1728_v5, %v1730_v40  ;;  %v915_v42 = vmul.f32 %v914_v57, %v907_v51 }
 0x444   : > { %v826_v45 = vsel %vm1773_vm11, %v824_v17, 0.0  ;;  %v857_v1 = vmul.f32 %v856_v44, %v847_v24  ;;  %v827_v25 = vsel %vm1777_vm12, %v825_v23, 0.0  ;;  %v858_v26 = vmul.f32 %v856_v44, %v848_v27 }
 0x445   : > { %v828_v58 = vadd.f32 %v826_v45, %v801_v53  ;;  %v829_v8 = vadd.f32 %v827_v25, %v802_v56  ;;  %v916_v18 = vmul.f32 %v914_v57, %v908_v62  ;;  %v941_v45 = vstv %s1901_s24 }
 0x446   : > { %v872_v33 = vpop.permute.xlu1 %871  ;;  %v870_v10 = vpop.permute.xlu0 %869  ;;  %v863_v30 = vadd.f32 %v861_v47, %v857_v1  ;;  %v864_v44 = vadd.f32 %v862_v46, %v858_v26 }
 0x447   : > { %v874_v48 = vsel %vm873_vm14, %v870_v10, %v872_v33  ;;  %v875_v55 = vsel %vm873_vm14, %v872_v33, %v870_v10  ;;  %v840_v15 = vadd.f32 %v1681_v22, %v828_v58  ;;  %v841_v20 = vadd.f32 %v1679_v21, %v829_v8 }
 0x448   : > { %v884_v59 = vmul.f32 %v883_v28, %v874_v48  ;;  %v885_v9 = vmul.f32 %v883_v28, %v875_v55  ;;  %v865_v19 = vsel %vm1782_vm13, %v863_v30, 0.0  ;;  %v866_v24 = vsel %vm1818_vm0, %v864_v44, 0.0 }
 0x449   : > { %v867_v27 = vadd.f32 %v865_v19, %v840_v15  ;;  %v937_v28 = vstv %s1891_s18  ;;  %v868_v1 = vadd.f32 %v866_v24, %v841_v20 }
 0x44a   : > { %v899_v13 = vpop.permute.xlu1 %898  ;;  %v897_v52 = vpop.permute.xlu0 %896  ;;  %v890_v14 = vadd.f32 %v888_v29, %v884_v59  ;;  %v891_v54 = vadd.f32 %v889_v39, %v885_v9 }
 0x44b   : > { %v902_v38 = vsel %vm900_vm2, %v899_v13, %v897_v52  ;;  %v901_v16 = vsel %vm900_vm2, %v897_v52, %v899_v13  ;;  %v963_v52 = vshrl.u32 %v323_v11, 7 }
 0x44c   : > { %v912_v17 = vmul.f32 %v910_v60, %v902_v38  ;;  %v892_v5 = vsel %vm1773_vm11, %v890_v14, 0.0  ;;  %v911_v21 = vmul.f32 %v910_v60, %v901_v16  ;;  %v893_v47 = vsel %vm1930_vm5, %v891_v54, 0.0 }
 0x44d   : > { %v894_v49 = vadd.f32 %v892_v5, %v867_v27  ;;  %v895_v58 = vadd.f32 %v893_v47, %v868_v1  ;;  %v964_v44 = vsub.s32 0, %v963_v52 }
 0x44e   : > { %v926_v23 = vpop.permute.xlu1 %925  ;;  %v924_v22 = vpop.permute.xlu0 %923  ;;  %v918_v40 = vadd.f32 %v916_v18, %v912_v17  ;;  %v917_v53 = vadd.f32 %v915_v42, %v911_v21 }
 0x44f   : > { %v928_v0 = vsel %vm927_vm4, %v924_v22, %v926_v23  ;;  %v929_v3 = vsel %vm927_vm4, %v926_v23, %v924_v22 }
 0x450   : > { %v920_v33 = vsel %vm361_vm3, %v918_v40, 0.0  ;;  %v938_v26 = vmul.f32 %v937_v28, %v928_v0  ;;  %v939_v48 = vmul.f32 %v937_v28, %v929_v3  ;;  %v921_v46 = vadd.f32 %v917_v53, %v894_v49 }
 0x451   : > { %v922_v61 = vadd.f32 %v920_v33, %v895_v58 }
 0x452   : > { %v933_v50 = vpop.permute.xlu1 %932  ;;  %v931_v63 = vpop.permute.xlu0 %930 }
 0x453   : > { %v934_v10 = vsel %vm927_vm4, %v931_v63, %v933_v50  ;;  %v935_v25 = vsel %vm927_vm4, %v933_v50, %v931_v63 }
 0x454   : > { %v942_v55 = vmul.f32 %v941_v45, %v934_v10  ;;  %v943_v56 = vmul.f32 %v941_v45, %v935_v25 }
 0x456   : > { %v944_v59 = vadd.f32 %v942_v55, %v938_v26  ;;  %v945_v60 = vadd.f32 %v943_v56, %v939_v48 }
 0x458   : > { %v946_v29 = vsel %vm1782_vm13, %v944_v59, 0.0  ;;  %v947_v30 = vsel %vm365_vm6, %v945_v60, 0.0 }
 0x459   : > { %v948_v6 = vadd.f32 %v946_v29, %v921_v46  ;;  %v949_v57 = vadd.f32 %v947_v30, %v922_v61 }
 0x45b   : > { %v1123_v62 = vmul.f32 -1.442695, %v948_v6  ;;  %v1124_v8 = vmul.f32 -1.442695, %v949_v57 }
 0x45d   : > { %1250 = vpow2.f32 %v1123_v62 }
 0x45e   : > { %1252 = vpow2.f32 %v1124_v8 }
 0x46a   : > { %v1251_v43 = vpop.eup %1250 }
 0x46b   : > { %v1253_v9 = vpop.eup %1252  ;;  %v956_v41 = vadd.f32 1.0, %v1251_v43 }
 0x46c   : > { %v957_v13 = vadd.f32 1.0, %v1253_v9 }
 0x46d   : > { %1254 = vrcp.f32 %v956_v41 }
 0x46e   : > { %1256 = vrcp.f32 %v957_v13 }
 0x47a   : > { %v1255_v12 = vpop.eup %1254 }
 0x47b   : > { %v1257_v14 = vpop.eup %1256  ;;  %v965_v38 = vrot.slane %v1255_v12, %v964_v44 }
 0x47c   : > { %v969_v39 = vrot.slane %v1257_v14, %v964_v44 }
 0x47d   : > { %v970_v15 = vmul.f32 %v965_v38, %v1640_v31  ;;  %v972_v16 = vmul.f32 %v965_v38, %v1646_v34  ;;  %v974_v17 = vmul.f32 %v965_v38, %v1652_v36  ;;  %v976_v18 = vmul.f32 %v965_v38, %v1664_v7 }
 0x47e   : > { %v971_v11 = vmul.f32 %v969_v39, %v1643_v32  ;;  %v973_v19 = vmul.f32 %v969_v39, %v1649_v35  ;;  %v975_v51 = vmul.f32 %v969_v39, %v1655_v37  ;;  %v977_v31 = vmul.f32 %v969_v39, %v1667_v2 }
 0x47f   : > { %978 = vst [vmem:[%s311_s9] sm:$0xff] %v970_v15  ;;  %980 = vst [vmem:[%s311_s9 + $0x10] sm:$0xff] %v972_v16 }
 0x480   : > { %982 = vst [vmem:[%s311_s9 + $0x20] sm:$0xff] %v974_v17  ;;  %984 = vst [vmem:[%s311_s9 + $0x30] sm:$0xff] %v976_v18 }
 0x481   : > { %979 = vst [vmem:[%s311_s9 + $0x8] sm:$0xff] %v971_v11  ;;  %981 = vst [vmem:[%s311_s9 + $0x18] sm:$0xff] %v973_v19 }
 0x482   : > { %983 = vst [vmem:[%s311_s9 + $0x28] sm:$0xff] %v975_v51  ;;  %985 = vst [vmem:[%s311_s9 + $0x38] sm:$0xff] %v977_v31 }
 0x483   : > { %1314 = shalt.err (!%p1311_p1)
}
 0x484   : > { %s1315_s22 = scalar_lea.hbm %s1967_s25, 1024  ;;  %s1319_s24 = scalar_lea.hbm %s2024_s7, 2048 }
 0x485   : > { %p1316_p4 = scmp.ne.s32.totalorder %s1967_s25, %s1315_s22  ;;  %p1320_p6 = scmp.lt.s32.totalorder %s1967_s25, %s2024_s7 }
 0x486   : > { %p1321_p13 = scmp.lt.s32.totalorder %s1319_s24, %s1315_s22 }
 0x487   : > { %p1317_p11 = pnand %p1316_p4, %p2056_p0 }
 0x488   : > { %p1322_p3 = por %p1321_p13, %p1320_p6 }
 0x489   : > { %p1318_p5 = pneg %p1317_p11 }
 0x48b   : > { %p1323_p12 = pnand %p1322_p3, %p1318_p5 }
 0x48d   : > { %1326 = shalt.err (!%p1323_p12)
}
 0x48e   : > { %s1387_s17 = smov 256  }
 0x48f   : > { %1167 = dma.vmem_to_hbm [thread:$0]  (%p2056_p0), %s1973_s12, 1024, %s1967_s25, %s987_s6, %s1387_s17, %s1387_s17, %s1380_s5  }
 0x490 PF: > { %s1015_s19 = sand.u32 1, %s1357_s26   ;;  %p2057_p2 = scmp.ne.s32.totalorder %s2033_s15, 0 }
 0x491   : > { %p2058_p7 = scmp.ge.s32.totalorder %s1369_s29, 2  ;;  %s1016_s23 = scalar_lea.sflag [#allocation5], %s1015_s19 }
 0x493   : > { %p1178_p8 = pnand %p2058_p7, %p2057_p2 }
 0x495   : > { %p1179_p9 = pneg %p1178_p8 }
 0x497   : > { %1352 = dma.done.wait (%p1179_p9), %s1016_s23, 1024  }
 0x498   : > { %1354 = vsyncadd (%p1179_p9), %s1016_s23, 4294966272  ;;  %p22_p10 = scmp.ge.s32.totalorder %s1456_s8, 4   ;;  %s2059_s26 = smov %s1361_s27 }
 0x499   : > { %s2060_s27 = smov %s1365_s28  ;;  %s2061_s28 = smov %s1468_s11 }
 0x49a   : > { %s2062_s29 = smov %s1456_s8  ;;  %24 = sbr.rel (!%p22_p10) target bundleno = 9 (0x9), region = 98 }
 0x49f   :  { %1021 = vsyncpa [#allocation4], 1 }
 0x4a0   :  { %1023 = vsyncpa [#allocation4 + $0x1], 1 }
 0x4a1   :  { %1024 = vsyncpa [#allocation5], 1 }
 0x4a2   :  { %1026 = vsyncpa [#allocation5 + $0x1], 1 }
 0x4a3   :  { %1027 = vsyncpa [#allocation6], 1 }
 0x4a4   :  { %1029 = vsyncpa [#allocation6 + $0x1], 1 }

</bundles_post_ra>
